<compile_context>
chip_gen: v6e
topology: v6e:2x2x1
jax: 0.10.0
libtpu: 0.0.40
codegen_flags: <defaults>
</compile_context>

<pallas_src>
import jax
import jax.numpy as jnp
from jax.experimental import pallas as pl
from jax.experimental.pallas import tpu as pltpu


def _round_up(x, m):
    return (x + m - 1) // m * m


def _tpu_generation():
    """Best-effort TPU generation from device_kind ('TPU v5 lite' -> 5)."""
    try:
        kind = jax.devices()[0].device_kind.lower()
    except Exception:
        return 6
    for g in (7, 6, 5, 4, 3, 2):
        if f"v{g}" in kind:
            return g
    return 6


def _vmem_capacity_bytes(gen):
    """Physical VMEM per core (v7x: 64 MiB, v5e/v6e: 128 MiB)."""
    try:
        return int(pltpu.get_tpu_info().vmem_capacity_bytes)
    except Exception:
        return (64 if gen >= 7 else 128) * 1024 * 1024


# -----------------------------------------------------------------------------
# Kernel 1: fused duration predictor (Variance_adaptor)
# -----------------------------------------------------------------------------
def _make_duration_predictor_kernel(bt, L, K, P, matmul_dtype):
    R = bt * L                                    # rows per block = bt * L

    def kernel(x_ref, w1_ref, w2_ref, sp_ref, out_ref):
        x = x_ref[...].astype(jnp.float32)        # (R, D)
        # Position of every row inside its own sequence; several sequences may
        # share one block, so conv taps must not leak across sequence borders.
        pos = jax.lax.broadcasted_iota(jnp.int32, (R, 1), 0) % L

        def layer_norm(v, g, b):                  # f32 elementwise (v5e-safe)
            mu = jnp.mean(v, axis=-1, keepdims=True)
            var = jnp.mean(jnp.square(v - mu), axis=-1, keepdims=True)
            return (v - mu) * jax.lax.rsqrt(var + 1e-5) * g + b

        def conv1d(v, w_ref, bias):               # v: (R, Cin) f32, w_ref: (K, Cin, Cout)
            # Center tap: no shift, no mask -- one cast + one MXU push.
            acc = jnp.dot(v.astype(matmul_dtype), w_ref[P],
                          preferred_element_type=jnp.float32)
            for t in range(K):                    # "same" conv = K shifted matmuls
                o = t - P
                if o == 0:
                    continue
                # rolled[r] = v[r + o]; rows whose neighbour falls outside their
                # own sequence are zeroed (== Conv1d zero padding).  XLU roll +
                # one unsigned VPU compare -- no concatenate, no unaligned slices.
                sh = pltpu.roll(v, shift=(-o) % R, axis=0)
                valid = (pos + o).astype(jnp.uint32) < jnp.uint32(L)
                sh = jnp.where(valid, sh, 0.0)
                acc = acc + jnp.dot(sh.astype(matmul_dtype), w_ref[t],
                                    preferred_element_type=jnp.float32)
            return acc + bias

        h = conv1d(x, w1_ref, sp_ref[0:1, :])                               # Conv1d + b1
        h = jnp.maximum(layer_norm(h, sp_ref[1:2, :], sp_ref[2:3, :]), 0.0)  # LN + ReLU
        h = conv1d(h, w2_ref, sp_ref[3:4, :])                               # Conv1d + b2
        h = jnp.maximum(layer_norm(h, sp_ref[4:5, :], sp_ref[5:6, :]), 0.0)  # LN + ReLU

        # Linear(F -> 1) + ReLU as a rowwise multiply-reduce -> (R, 1) column.
        c = jnp.sum(h * sp_ref[6:7, :], axis=-1, keepdims=True) + sp_ref[7:8, 0:1]
        c = jnp.maximum(c, 0.0)

        # Lane-dense store: move the (R, 1) column to a (bt, L) tile.
        #   z[r, l]      = c[r]  if l == r % L else 0        (VPU scatter)
        #   y[b, l]      = sum_r [r // L == b] * z[r, l]     (tiny exact MXU matmul)
        # Exactly one term is nonzero per output cell, so this is bit-exact and
        # replaces R/8 masked width-1 stores with one lane-dense block store.
        lane = jax.lax.broadcasted_iota(jnp.int32, (R, L), 1)
        z = jnp.where(lane == pos, c, 0.0)                                   # (R, L) f32
        rowb = jax.lax.broadcasted_iota(jnp.int32, (bt, R), 0)
        colr = jax.lax.broadcasted_iota(jnp.int32, (bt, R), 1)
        gather = ((colr - rowb * L).astype(jnp.uint32)
                  < jnp.uint32(L)).astype(jnp.float32)                       # (bt, R)
        y = jnp.dot(gather, z, preferred_element_type=jnp.float32)           # (bt, L)
        out_ref[...] = y.astype(out_ref.dtype)

    return kernel


def _pick_batch_tile(B, L, D, F, vmem_cap):
    """Fold as many sequences per block as a per-generation VMEM budget allows.

    Legal batch tiles: bt == B (full-extent blocks are always legal) or bt a
    multiple of 8 (the (8,128) rule on the (bt, L) output block).  Keep >=2
    grid steps when blocks stay large enough so both v7x TensorCores get work
    and input/output DMA pipelines."""
    # f32 live bytes per folded row: double-buffered x block, activations,
    # rolled/masked tap temporary, conv accumulator, lane-scatter tile.
    per_row = 4 * (2 * D + 3 * F + max(D, F) + L)
    budget = max(2 * 1024 * 1024, vmem_cap // 4)
    cap = max(1, budget // max(1, per_row * L))
    cands = [b for b in range(1, B + 1)
             if B % b == 0 and (b == B or b % 8 == 0)]
    fits = [b for b in cands if b <= cap]
    bt = max(fits) if fits else min(cands)
    if bt == B:
        smaller = [b for b in fits if b < B and b * L >= 256]
        if smaller:
            bt = max(smaller)
    return bt


def duration_predictor_pallas(params, x, cfg, matmul_dtype=jnp.bfloat16):
    B, L, D = x.shape
    F = cfg['duration_predictor_filter_size']
    K = cfg['duration_predictor_kernel_size']
    P = 1                                          # Conv1d(..., padding=1)
    assert K == 2 * P + 1, "padding=1 is length-preserving only for kernel_size==3"

    gen = _tpu_generation()
    vmem_cap = _vmem_capacity_bytes(gen)

    # MXU operands in matmul_dtype (bf16 in production); f32 accumulation in-kernel.
    w1 = params['w1'].astype(matmul_dtype)         # (K, D, F)
    w2 = params['w2'].astype(matmul_dtype)         # (K, F, F)
    # Pack all small per-channel params into one (8, F) f32 array: one DMA window
    # instead of eight tiny double-buffered ones.
    sp = jnp.stack([params['b1'], params['g1'], params['be1'],
                    params['b2'], params['g2'], params['be2'],
                    params['wl'],
                    jnp.full((F,), params['bl'], jnp.float32)],
                   axis=0).astype(jnp.float32)     # rows: b1,g1,be1,b2,g2,be2,wl,bl

    bt = _pick_batch_tile(B, L, D, F, vmem_cap)
    rows = bt * L
    x2 = x.reshape(B * L, D)                       # wrapper-side layout plumbing
    vmem_limit = min(64 * 1024 * 1024, vmem_cap // 2)

    out = pl.pallas_call(
        _make_duration_predictor_kernel(bt, L, K, P, matmul_dtype),
        out_shape=jax.ShapeDtypeStruct((B, L), jnp.float32),
        grid=(B // bt,),
        in_specs=[
            pl.BlockSpec((rows, D), lambda i: (i, 0)),      # batch-folded activations
            pl.BlockSpec((K, D, F), lambda i: (0, 0, 0)),   # conv1 weight (resident)
            pl.BlockSpec((K, F, F), lambda i: (0, 0, 0)),   # conv2 weight (resident)
            pl.BlockSpec((8, F), lambda i: (0, 0)),         # packed small params
        ],
        out_specs=pl.BlockSpec((bt, L), lambda i: (i, 0)),  # lane-dense (bt, L) tile
        compiler_params=pltpu.CompilerParams(
            dimension_semantics=("parallel",),
            vmem_limit_bytes=vmem_limit),
    )(x2, w1, w2, sp)
    return out                                     # (B, L)


# -----------------------------------------------------------------------------
# Kernel 2: length regulation (alignment @ x) with in-kernel alignment build
# -----------------------------------------------------------------------------
def _make_lr_kernel(Tt, matmul_dtype):
    def kernel(totals_ref, bounds_ref, x_ref, out_ref):
        tile_start = pl.program_id(1) * Tt          # first mel frame of this tile
        total = totals_ref[pl.program_id(0)]        # total frames of this sequence

        @pl.when(tile_start < total)
        def _():
            t_idx = tile_start + jax.lax.broadcasted_iota(jnp.int32, (Tt, 1), 0)
            bd = bounds_ref[0]                                       # (2, L) int32
            start, dlen = bd[0:1, :], bd[1:2, :]                     # (1, L)
            # One unsigned compare builds the alignment row mask:
            #   0 <= t - start < dlen   <=>   uint(t - start) < uint(dlen)
            align = ((t_idx - start).astype(jnp.uint32)
                     < dlen.astype(jnp.uint32)).astype(matmul_dtype)  # (Tt, L)
            out = jnp.dot(align, x_ref[0],
                          preferred_element_type=jnp.float32)         # (Tt, D)
            out_ref[0] = out.astype(out_ref.dtype)

        @pl.when(tile_start >= total)
        def _():
            # Tile is entirely past this sequence's last frame: skip the mask
            # build and the MXU matmul, just zero-fill.
            out_ref[...] = jnp.zeros_like(out_ref)

    return kernel


def length_regulate_pallas(x, durations, mel_max_length, matmul_dtype=jnp.bfloat16):
    """output[b, t] = x[b, l]  for  cumsum[b, :l] <= t < cumsum[b, :l+1]  (else 0)."""
    B, L, D = x.shape
    gen = _tpu_generation()
    vmem_cap = _vmem_capacity_bytes(gen)

    durations = durations.astype(jnp.int32)
    end = jnp.cumsum(durations, axis=-1)
    bounds = jnp.stack([end - durations, durations], axis=1)         # (B, 2, L): start, len
    totals = end[:, L - 1]                                           # (B,) frames per seq

    T = int(mel_max_length)
    # Mel-frame tile: 256 fills the 256-wide MXU on v6e/v7x; v5e's MXU is
    # 128-wide, keep 128 there.  Tiny T just rounds up to the sublane tile.
    if gen >= 6 and T >= 256:
        Tt = 256
    elif T >= 128:
        Tt = 128
    else:
        Tt = _round_up(T, 8)
    T_pad = _round_up(T, Tt)

    # Cast x once in the wrapper: halves the x HBM->VMEM stream for bf16 and
    # removes a per-tile in-kernel cast.
    x_mm = x.astype(matmul_dtype)
    vmem_limit = min(64 * 1024 * 1024, vmem_cap // 2)

    out = pl.pallas_call(
        _make_lr_kernel(Tt, matmul_dtype),
        out_shape=jax.ShapeDtypeStruct((B, T_pad, D), x.dtype),
        grid_spec=pltpu.PrefetchScalarGridSpec(
            num_scalar_prefetch=1,                                   # totals -> SMEM
            grid=(B, T_pad // Tt),
            in_specs=[
                pl.BlockSpec((1, 2, L), lambda b, t, tot: (b, 0, 0)),  # O(L) bounds
                pl.BlockSpec((1, L, D), lambda b, t, tot: (b, 0, 0)),  # tokens
            ],
            out_specs=pl.BlockSpec((1, Tt, D), lambda b, t, tot: (b, t, 0)),
        ),
        compiler_params=pltpu.CompilerParams(
            dimension_semantics=("parallel", "parallel"),
            vmem_limit_bytes=vmem_limit),
    )(totals, bounds, x_mm)
    return out[:, :T, :]


# -----------------------------------------------------------------------------
# LengthRegulator.forward
# -----------------------------------------------------------------------------
def length_regulator_forward(params, x, cfg, alpha=1.0, target=None,
                             mel_max_length=None, matmul_dtype=jnp.bfloat16):
    dur_pred = duration_predictor_pallas(params, x, cfg, matmul_dtype)   # (B, L)
    if target is not None:
        if mel_max_length is not None:
            T = int(mel_max_length)
        else:
            # Forces a device->host sync; pass a static mel_max_length under jit.
            T = int(jnp.max(jnp.sum(target, -1)))
        out = length_regulate_pallas(x, target, T, matmul_dtype)
        return out, dur_pred
    # Inference branch: matches torch (expm1(out) * alpha + 0.5).int() (trunc).
    dur = (jnp.expm1(dur_pred) * alpha + 0.5).astype(jnp.int32)
    if mel_max_length is not None:
        T = int(mel_max_length)
    else:
        # Forces a device->host sync; pass a static mel_max_length under jit.
        T = int(jnp.max(jnp.sum(dur, -1)))
    out = length_regulate_pallas(x, dur, T, matmul_dtype)
    mel_pos = jnp.arange(1, T + 1, dtype=jnp.int32)[None, :]
    return out, mel_pos


# -----------------------------------------------------------------------------
# Pure-JAX references (same math) for correctness checking
# -----------------------------------------------------------------------------
def duration_predictor_ref(params, x, cfg):
    K = cfg['duration_predictor_kernel_size']
    P = 1
    B, L, D = x.shape

    def conv(v, w, b):                              # v (B,L,Cin), w (K,Cin,Cout)
        vp = jnp.pad(v, ((0, 0), (P, P), (0, 0)))
        return sum(vp[:, t:t + L, :] @ w[t] for t in range(K)) + b

    def ln(v, g, be):
        mu = v.mean(-1, keepdims=True)
        var = ((v - mu) ** 2).mean(-1, keepdims=True)
        return (v - mu) / jnp.sqrt(var + 1e-5) * g + be

    h = jax.nn.relu(ln(conv(x, params['w1'], params['b1']), params['g1'], params['be1']))
    h = jax.nn.relu(ln(conv(h, params['w2'], params['b2']), params['g2'], params['be2']))
    d = jax.nn.relu(h @ params['wl'][:, None] + params['bl'])            # (B, L, 1)
    return d[..., 0]


def length_regulate_ref(x, durations, T):
    durations = durations.astype(jnp.int32)
    end = jnp.cumsum(durations, -1)
    start = end - durations
    t = jnp.arange(T, dtype=jnp.int32)[None, :, None]                    # (1, T, 1)
    align = ((t >= start[:, None, :]) & (t < end[:, None, :])).astype(x.dtype)
    return align @ x                                                     # (B, T, D)


# -----------------------------------------------------------------------------
# Deterministic parameter init (shapes follow Variance_adaptor.__init__)
# -----------------------------------------------------------------------------
def init_params(key, cfg):
    D = cfg['encoder_dim']
    F = cfg['duration_predictor_filter_size']
    K = cfg['duration_predictor_kernel_size']
    ks = jax.random.split(key, 9)

    def rn(k, shape, scale):
        return jax.random.normal(k, shape, jnp.float32) * scale

    return dict(
        # Conv1d weights stored as (K, in_ch, out_ch) [= PyTorch (out,in,K) transposed]
        w1=rn(ks[0], (K, D, F), (D * K) ** -0.5),
        b1=0.05 * rn(ks[1], (F,), 1.0),
        g1=1.0 + 0.1 * rn(ks[2], (F,), 1.0),
        be1=0.05 * rn(ks[3], (F,), 1.0),
        w2=rn(ks[4], (K, F, F), (F * K) ** -0.5),
        b2=0.05 * rn(ks[5], (F,), 1.0),
        g2=1.0 + 0.1 * rn(ks[6], (F,), 1.0),
        be2=0.05 * rn(ks[7], (F,), 1.0),
        wl=rn(ks[8], (F,), F ** -0.5),
        bl=jnp.float32(0.1),
    )


if __name__ == "__main__":
    model_config = dict(
        encoder_dim=32,
        duration_predictor_filter_size=64,
        duration_predictor_kernel_size=3,
        duration_predictor_dropout=0.1,            # eval mode -> identity
    )

    key = jax.random.PRNGKey(0)
    k_params, k_x = jax.random.split(key)
    params = init_params(k_params, model_config)

    B, L, D = 2, 8, model_config['encoder_dim']
    x = jax.random.normal(k_x, (B, L, D), jnp.float32)
    target = jnp.array([[2, 1, 3, 2, 1, 2, 3, 2],
                        [1, 2, 2, 1, 3, 1, 0, 0]], dtype=jnp.int32)      # row sums 16, 10
    mel_max_length = 20

    dur_ref = duration_predictor_ref(params, x, model_config)
    out_ref = length_regulate_ref(x, target, mel_max_length)

    # -- training path (target durations), f32 MXU operands: tight check -------
    out_f32, dur_f32 = length_regulator_forward(
        params, x, model_config, target=target, mel_max_length=mel_max_length,
        matmul_dtype=jnp.float32)
    out_f32, dur_f32 = jax.block_until_ready((out_f32, dur_f32))
    assert out_f32.shape == (B, mel_max_length, D)
    assert dur_f32.shape == (B, L)
    assert bool(jnp.all(jnp.isfinite(out_f32))) and bool(jnp.all(jnp.isfinite(dur_f32)))
    assert bool(jnp.allclose(dur_f32, dur_ref, atol=5e-4, rtol=5e-4)), \
        "duration predictor mismatch (f32)"
    assert bool(jnp.allclose(out_f32, out_ref, atol=5e-4, rtol=5e-4)), \
        "length regulator mismatch (f32)"

    # -- same path, bf16 MXU operands + f32 accumulation (production config) ---
    out_bf, dur_bf = length_regulator_forward(
        params, x, model_config, target=target, mel_max_length=mel_max_length,
        matmul_dtype=jnp.bfloat16)
    out_bf, dur_bf = jax.block_until_ready((out_bf, dur_bf))
    assert bool(jnp.allclose(dur_bf, dur_ref, atol=5e-2, rtol=5e-2)), \
        "duration predictor mismatch (bf16)"
    assert bool(jnp.allclose(out_bf, out_ref, atol=5e-2, rtol=5e-2)), \
        "length regulator mismatch (bf16)"

    # -- inference path (predicted durations, static mel-length cap) -----------
    out_inf, mel_pos = length_regulator_forward(
        params, x, model_config, alpha=1.0, mel_max_length=mel_max_length,
        matmul_dtype=jnp.bfloat16)
    out_inf = jax.block_until_ready(out_inf)
    assert out_inf.shape == (B, mel_max_length, D)
    assert mel_pos.shape == (1, mel_max_length)
    assert bool(jnp.all(jnp.isfinite(out_inf)))

    print("KERNEL_OK")
</pallas_src>

<mosaic_0001>
module attributes {stable_mosaic.version = 11 : i64} {
  func.func @kernel(%arg0: i32, %arg1: memref<16x32xf32, #tpu.memory_space<vmem>>, %arg2: memref<3x32x64xf32, #tpu.memory_space<vmem>>, %arg3: memref<3x64x64xf32, #tpu.memory_space<vmem>>, %arg4: memref<8x64xf32, #tpu.memory_space<vmem>>, %arg5: memref<2x8xf32, #tpu.memory_space<vmem>>) attributes {dimension_semantics = [#tpu.dimension_semantics<parallel>], iteration_bounds = array<i64: 1>, scalar_prefetch = 0 : i64, scratch_operands = 0 : i64, tpu.core_type = #tpu.core_type<tc>, window_params = [{transform_indices = @transform_0, window_bounds = array<i64: 16, 32>}, {pipeline_mode = #tpu.pipeline_mode<synchronous>, transform_indices = @transform_1, window_bounds = array<i64: 3, 32, 64>}, {pipeline_mode = #tpu.pipeline_mode<synchronous>, transform_indices = @transform_2, window_bounds = array<i64: 3, 64, 64>}, {pipeline_mode = #tpu.pipeline_mode<synchronous>, transform_indices = @transform_3, window_bounds = array<i64: 8, 64>}, {transform_indices = @transform_4, window_bounds = array<i64: 2, 8>}]} {
    %c0 = arith.constant 0 : index
    %c0_0 = arith.constant 0 : index
    %0 = vector.load %arg1[%c0, %c0_0] : memref<16x32xf32, #tpu.memory_space<vmem>>, vector<16x32xf32>
    %1 = tpu.iota {dimensions = array<i32: 0>} : vector<16x1xi32>
    %c8_i32 = arith.constant 8 : i32
    %c0_i32 = arith.constant 0 : i32
    %2 = arith.cmpi eq, %c8_i32, %c0_i32 : i32
    %c1_i32 = arith.constant 1 : i32
    %3 = arith.select %2, %c1_i32, %c8_i32 : i32
    %4 = vector.broadcast %3 : i32 to vector<16x1xi32>
    %5 = arith.remsi %1, %4 : vector<16x1xi32>
    %c0_i32_1 = arith.constant 0 : i32
    %6 = vector.broadcast %c0_i32_1 : i32 to vector<16x1xi32>
    %7 = arith.cmpi ne, %5, %6 : vector<16x1xi32>
    %c0_i32_2 = arith.constant 0 : i32
    %8 = vector.broadcast %c0_i32_2 : i32 to vector<16x1xi32>
    %9 = arith.cmpi slt, %5, %8 : vector<16x1xi32>
    %c0_i32_3 = arith.constant 0 : i32
    %10 = arith.cmpi slt, %3, %c0_i32_3 : i32
    %11 = vector.broadcast %10 : i1 to vector<16x1xi1>
    %12 = vector.broadcast %11 : vector<16x1xi1> to vector<16x1xi1>
    %13 = arith.xori %9, %12 : vector<16x1xi1>
    %14 = arith.andi %13, %7 : vector<16x1xi1>
    %15 = vector.broadcast %3 : i32 to vector<16x1xi32>
    %16 = arith.addi %5, %15 : vector<16x1xi32>
    %17 = arith.select %14, %16, %5 : vector<16x1xi1>, vector<16x1xi32>
    %c0_4 = arith.constant 0 : index
    %c0_5 = arith.constant 0 : index
    %18 = vector.load %arg4[%c0_4, %c0_5] : memref<8x64xf32, #tpu.memory_space<vmem>>, vector<1x64xf32>
    %c1 = arith.constant 1 : index
    %c0_6 = arith.constant 0 : index
    %c0_7 = arith.constant 0 : index
    %19 = vector.load %arg2[%c1, %c0_6, %c0_7] : memref<3x32x64xf32, #tpu.memory_space<vmem>>, vector<1x32x64xf32>
    %20 = vector.shape_cast %19 : vector<1x32x64xf32> to vector<32x64xf32>
    %cst = arith.constant dense<0.000000e+00> : vector<16x64xf32>
    %21 = tpu.matmul %0, %20, %cst {dimension_numbers = #tpu.dot_dimension_numbers<[1], [0], [0], [1], [0, 0, 1, 1], [], []>} : vector<16x32xf32>, vector<32x64xf32>, vector<16x64xf32> -> vector<16x64xf32>
    %c1_i32_8 = arith.constant 1 : i32
    %22 = tpu.dynamic_rotate %0 by %c1_i32_8 dim 0 : vector<16x32xf32>, i32 -> vector<16x32xf32>
    %c-1_i32 = arith.constant -1 : i32
    %23 = vector.broadcast %c-1_i32 : i32 to vector<16x1xi32>
    %24 = arith.addi %17, %23 : vector<16x1xi32>
    %c8_i32_9 = arith.constant 8 : i32
    %25 = vector.broadcast %c8_i32_9 : i32 to vector<16x1xi32>
    %26 = arith.cmpi ult, %24, %25 : vector<16x1xi32>
    %cst_10 = arith.constant 0.000000e+00 : f32
    %27 = vector.shape_cast %26 : vector<16x1xi1> to vector<16x1xi1>
    %28 = vector.broadcast %27 : vector<16x1xi1> to vector<16x32xi1>
    %29 = vector.broadcast %cst_10 : f32 to vector<16x32xf32>
    %30 = arith.select %28, %22, %29 : vector<16x32xi1>, vector<16x32xf32>
    %c0_11 = arith.constant 0 : index
    %c0_12 = arith.constant 0 : index
    %c0_13 = arith.constant 0 : index
    %31 = vector.load %arg2[%c0_11, %c0_12, %c0_13] : memref<3x32x64xf32, #tpu.memory_space<vmem>>, vector<1x32x64xf32>
    %32 = vector.shape_cast %31 : vector<1x32x64xf32> to vector<32x64xf32>
    %cst_14 = arith.constant dense<0.000000e+00> : vector<16x64xf32>
    %33 = tpu.matmul %30, %32, %cst_14 {dimension_numbers = #tpu.dot_dimension_numbers<[1], [0], [0], [1], [0, 0, 1, 1], [], []>} : vector<16x32xf32>, vector<32x64xf32>, vector<16x64xf32> -> vector<16x64xf32>
    %34 = arith.addf %21, %33 : vector<16x64xf32>
    %c15_i32 = arith.constant 15 : i32
    %35 = tpu.dynamic_rotate %0 by %c15_i32 dim 0 : vector<16x32xf32>, i32 -> vector<16x32xf32>
    %c1_i32_15 = arith.constant 1 : i32
    %36 = vector.broadcast %c1_i32_15 : i32 to vector<16x1xi32>
    %37 = arith.addi %17, %36 : vector<16x1xi32>
    %c8_i32_16 = arith.constant 8 : i32
    %38 = vector.broadcast %c8_i32_16 : i32 to vector<16x1xi32>
    %39 = arith.cmpi ult, %37, %38 : vector<16x1xi32>
    %cst_17 = arith.constant 0.000000e+00 : f32
    %40 = vector.shape_cast %39 : vector<16x1xi1> to vector<16x1xi1>
    %41 = vector.broadcast %40 : vector<16x1xi1> to vector<16x32xi1>
    %42 = vector.broadcast %cst_17 : f32 to vector<16x32xf32>
    %43 = arith.select %41, %35, %42 : vector<16x32xi1>, vector<16x32xf32>
    %c2 = arith.constant 2 : index
    %c0_18 = arith.constant 0 : index
    %c0_19 = arith.constant 0 : index
    %44 = vector.load %arg2[%c2, %c0_18, %c0_19] : memref<3x32x64xf32, #tpu.memory_space<vmem>>, vector<1x32x64xf32>
    %45 = vector.shape_cast %44 : vector<1x32x64xf32> to vector<32x64xf32>
    %cst_20 = arith.constant dense<0.000000e+00> : vector<16x64xf32>
    %46 = tpu.matmul %43, %45, %cst_20 {dimension_numbers = #tpu.dot_dimension_numbers<[1], [0], [0], [1], [0, 0, 1, 1], [], []>} : vector<16x32xf32>, vector<32x64xf32>, vector<16x64xf32> -> vector<16x64xf32>
    %47 = arith.addf %34, %46 : vector<16x64xf32>
    %48 = vector.broadcast %18 : vector<1x64xf32> to vector<16x64xf32>
    %49 = arith.addf %47, %48 : vector<16x64xf32>
    %c1_21 = arith.constant 1 : index
    %c0_22 = arith.constant 0 : index
    %50 = vector.load %arg4[%c1_21, %c0_22] : memref<8x64xf32, #tpu.memory_space<vmem>>, vector<1x64xf32>
    %c2_23 = arith.constant 2 : index
    %c0_24 = arith.constant 0 : index
    %51 = vector.load %arg4[%c2_23, %c0_24] : memref<8x64xf32, #tpu.memory_space<vmem>>, vector<1x64xf32>
    %cst_25 = arith.constant dense<0.000000e+00> : vector<16xf32>
    %52 = vector.multi_reduction <add>, %49, %cst_25 [1] : vector<16x64xf32> to vector<16xf32>
    %53 = vector.shape_cast %52 : vector<16xf32> to vector<16x1xf32>
    %cst_26 = arith.constant 6.400000e+01 : f32
    %54 = vector.broadcast %cst_26 : f32 to vector<16x1xf32>
    %55 = arith.divf %53, %54 : vector<16x1xf32>
    %56 = vector.broadcast %55 : vector<16x1xf32> to vector<16x64xf32>
    %57 = arith.subf %49, %56 : vector<16x64xf32>
    %58 = arith.mulf %57, %57 : vector<16x64xf32>
    %cst_27 = arith.constant dense<0.000000e+00> : vector<16xf32>
    %59 = vector.multi_reduction <add>, %58, %cst_27 [1] : vector<16x64xf32> to vector<16xf32>
    %60 = vector.shape_cast %59 : vector<16xf32> to vector<16x1xf32>
    %cst_28 = arith.constant 6.400000e+01 : f32
    %61 = vector.broadcast %cst_28 : f32 to vector<16x1xf32>
    %62 = arith.divf %60, %61 : vector<16x1xf32>
    %63 = vector.broadcast %55 : vector<16x1xf32> to vector<16x64xf32>
    %64 = arith.subf %49, %63 : vector<16x64xf32>
    %cst_29 = arith.constant 9.99999974E-6 : f32
    %65 = vector.broadcast %cst_29 : f32 to vector<16x1xf32>
    %66 = arith.addf %62, %65 : vector<16x1xf32>
    %67 = math.rsqrt %66 : vector<16x1xf32>
    %68 = vector.broadcast %67 : vector<16x1xf32> to vector<16x64xf32>
    %69 = arith.mulf %64, %68 : vector<16x64xf32>
    %70 = vector.broadcast %50 : vector<1x64xf32> to vector<16x64xf32>
    %71 = arith.mulf %69, %70 : vector<16x64xf32>
    %72 = vector.broadcast %51 : vector<1x64xf32> to vector<16x64xf32>
    %73 = arith.addf %71, %72 : vector<16x64xf32>
    %cst_30 = arith.constant 0.000000e+00 : f32
    %74 = vector.broadcast %cst_30 : f32 to vector<16x64xf32>
    %75 = arith.maximumf %73, %74 : vector<16x64xf32>
    %c3 = arith.constant 3 : index
    %c0_31 = arith.constant 0 : index
    %76 = vector.load %arg4[%c3, %c0_31] : memref<8x64xf32, #tpu.memory_space<vmem>>, vector<1x64xf32>
    %c1_32 = arith.constant 1 : index
    %c0_33 = arith.constant 0 : index
    %c0_34 = arith.constant 0 : index
    %77 = vector.load %arg3[%c1_32, %c0_33, %c0_34] : memref<3x64x64xf32, #tpu.memory_space<vmem>>, vector<1x64x64xf32>
    %78 = vector.shape_cast %77 : vector<1x64x64xf32> to vector<64x64xf32>
    %cst_35 = arith.constant dense<0.000000e+00> : vector<16x64xf32>
    %79 = tpu.matmul %75, %78, %cst_35 {dimension_numbers = #tpu.dot_dimension_numbers<[1], [0], [0], [1], [0, 0, 1, 1], [], []>} : vector<16x64xf32>, vector<64x64xf32>, vector<16x64xf32> -> vector<16x64xf32>
    %c1_i32_36 = arith.constant 1 : i32
    %80 = tpu.dynamic_rotate %75 by %c1_i32_36 dim 0 : vector<16x64xf32>, i32 -> vector<16x64xf32>
    %c-1_i32_37 = arith.constant -1 : i32
    %81 = vector.broadcast %c-1_i32_37 : i32 to vector<16x1xi32>
    %82 = arith.addi %17, %81 : vector<16x1xi32>
    %c8_i32_38 = arith.constant 8 : i32
    %83 = vector.broadcast %c8_i32_38 : i32 to vector<16x1xi32>
    %84 = arith.cmpi ult, %82, %83 : vector<16x1xi32>
    %cst_39 = arith.constant 0.000000e+00 : f32
    %85 = vector.shape_cast %84 : vector<16x1xi1> to vector<16x1xi1>
    %86 = vector.broadcast %85 : vector<16x1xi1> to vector<16x64xi1>
    %87 = vector.broadcast %cst_39 : f32 to vector<16x64xf32>
    %88 = arith.select %86, %80, %87 : vector<16x64xi1>, vector<16x64xf32>
    %c0_40 = arith.constant 0 : index
    %c0_41 = arith.constant 0 : index
    %c0_42 = arith.constant 0 : index
    %89 = vector.load %arg3[%c0_40, %c0_41, %c0_42] : memref<3x64x64xf32, #tpu.memory_space<vmem>>, vector<1x64x64xf32>
    %90 = vector.shape_cast %89 : vector<1x64x64xf32> to vector<64x64xf32>
    %cst_43 = arith.constant dense<0.000000e+00> : vector<16x64xf32>
    %91 = tpu.matmul %88, %90, %cst_43 {dimension_numbers = #tpu.dot_dimension_numbers<[1], [0], [0], [1], [0, 0, 1, 1], [], []>} : vector<16x64xf32>, vector<64x64xf32>, vector<16x64xf32> -> vector<16x64xf32>
    %92 = arith.addf %79, %91 : vector<16x64xf32>
    %c15_i32_44 = arith.constant 15 : i32
    %93 = tpu.dynamic_rotate %75 by %c15_i32_44 dim 0 : vector<16x64xf32>, i32 -> vector<16x64xf32>
    %c1_i32_45 = arith.constant 1 : i32
    %94 = vector.broadcast %c1_i32_45 : i32 to vector<16x1xi32>
    %95 = arith.addi %17, %94 : vector<16x1xi32>
    %c8_i32_46 = arith.constant 8 : i32
    %96 = vector.broadcast %c8_i32_46 : i32 to vector<16x1xi32>
    %97 = arith.cmpi ult, %95, %96 : vector<16x1xi32>
    %cst_47 = arith.constant 0.000000e+00 : f32
    %98 = vector.shape_cast %97 : vector<16x1xi1> to vector<16x1xi1>
    %99 = vector.broadcast %98 : vector<16x1xi1> to vector<16x64xi1>
    %100 = vector.broadcast %cst_47 : f32 to vector<16x64xf32>
    %101 = arith.select %99, %93, %100 : vector<16x64xi1>, vector<16x64xf32>
    %c2_48 = arith.constant 2 : index
    %c0_49 = arith.constant 0 : index
    %c0_50 = arith.constant 0 : index
    %102 = vector.load %arg3[%c2_48, %c0_49, %c0_50] : memref<3x64x64xf32, #tpu.memory_space<vmem>>, vector<1x64x64xf32>
    %103 = vector.shape_cast %102 : vector<1x64x64xf32> to vector<64x64xf32>
    %cst_51 = arith.constant dense<0.000000e+00> : vector<16x64xf32>
    %104 = tpu.matmul %101, %103, %cst_51 {dimension_numbers = #tpu.dot_dimension_numbers<[1], [0], [0], [1], [0, 0, 1, 1], [], []>} : vector<16x64xf32>, vector<64x64xf32>, vector<16x64xf32> -> vector<16x64xf32>
    %105 = arith.addf %92, %104 : vector<16x64xf32>
    %106 = vector.broadcast %76 : vector<1x64xf32> to vector<16x64xf32>
    %107 = arith.addf %105, %106 : vector<16x64xf32>
    %c4 = arith.constant 4 : index
    %c0_52 = arith.constant 0 : index
    %108 = vector.load %arg4[%c4, %c0_52] : memref<8x64xf32, #tpu.memory_space<vmem>>, vector<1x64xf32>
    %c5 = arith.constant 5 : index
    %c0_53 = arith.constant 0 : index
    %109 = vector.load %arg4[%c5, %c0_53] : memref<8x64xf32, #tpu.memory_space<vmem>>, vector<1x64xf32>
    %cst_54 = arith.constant dense<0.000000e+00> : vector<16xf32>
    %110 = vector.multi_reduction <add>, %107, %cst_54 [1] : vector<16x64xf32> to vector<16xf32>
    %111 = vector.shape_cast %110 : vector<16xf32> to vector<16x1xf32>
    %cst_55 = arith.constant 6.400000e+01 : f32
    %112 = vector.broadcast %cst_55 : f32 to vector<16x1xf32>
    %113 = arith.divf %111, %112 : vector<16x1xf32>
    %114 = vector.broadcast %113 : vector<16x1xf32> to vector<16x64xf32>
    %115 = arith.subf %107, %114 : vector<16x64xf32>
    %116 = arith.mulf %115, %115 : vector<16x64xf32>
    %cst_56 = arith.constant dense<0.000000e+00> : vector<16xf32>
    %117 = vector.multi_reduction <add>, %116, %cst_56 [1] : vector<16x64xf32> to vector<16xf32>
    %118 = vector.shape_cast %117 : vector<16xf32> to vector<16x1xf32>
    %cst_57 = arith.constant 6.400000e+01 : f32
    %119 = vector.broadcast %cst_57 : f32 to vector<16x1xf32>
    %120 = arith.divf %118, %119 : vector<16x1xf32>
    %121 = vector.broadcast %113 : vector<16x1xf32> to vector<16x64xf32>
    %122 = arith.subf %107, %121 : vector<16x64xf32>
    %cst_58 = arith.constant 9.99999974E-6 : f32
    %123 = vector.broadcast %cst_58 : f32 to vector<16x1xf32>
    %124 = arith.addf %120, %123 : vector<16x1xf32>
    %125 = math.rsqrt %124 : vector<16x1xf32>
    %126 = vector.broadcast %125 : vector<16x1xf32> to vector<16x64xf32>
    %127 = arith.mulf %122, %126 : vector<16x64xf32>
    %128 = vector.broadcast %108 : vector<1x64xf32> to vector<16x64xf32>
    %129 = arith.mulf %127, %128 : vector<16x64xf32>
    %130 = vector.broadcast %109 : vector<1x64xf32> to vector<16x64xf32>
    %131 = arith.addf %129, %130 : vector<16x64xf32>
    %cst_59 = arith.constant 0.000000e+00 : f32
    %132 = vector.broadcast %cst_59 : f32 to vector<16x64xf32>
    %133 = arith.maximumf %131, %132 : vector<16x64xf32>
    %c6 = arith.constant 6 : index
    %c0_60 = arith.constant 0 : index
    %134 = vector.load %arg4[%c6, %c0_60] : memref<8x64xf32, #tpu.memory_space<vmem>>, vector<1x64xf32>
    %135 = vector.broadcast %134 : vector<1x64xf32> to vector<16x64xf32>
    %136 = arith.mulf %133, %135 : vector<16x64xf32>
    %cst_61 = arith.constant dense<0.000000e+00> : vector<16xf32>
    %137 = vector.multi_reduction <add>, %136, %cst_61 [1] : vector<16x64xf32> to vector<16xf32>
    %138 = vector.shape_cast %137 : vector<16xf32> to vector<16x1xf32>
    %c7 = arith.constant 7 : index
    %c0_62 = arith.constant 0 : index
    %139 = vector.load %arg4[%c7, %c0_62] : memref<8x64xf32, #tpu.memory_space<vmem>>, vector<1x1xf32>
    %140 = vector.broadcast %139 : vector<1x1xf32> to vector<16x1xf32>
    %141 = arith.addf %138, %140 : vector<16x1xf32>
    %cst_63 = arith.constant 0.000000e+00 : f32
    %142 = vector.broadcast %cst_63 : f32 to vector<16x1xf32>
    %143 = arith.maximumf %141, %142 : vector<16x1xf32>
    %144 = tpu.iota {dimensions = array<i32: 1>} : vector<16x8xi32>
    %145 = vector.broadcast %17 : vector<16x1xi32> to vector<16x8xi32>
    %146 = arith.cmpi eq, %144, %145 : vector<16x8xi32>
    %cst_64 = arith.constant 0.000000e+00 : f32
    %147 = vector.shape_cast %143 : vector<16x1xf32> to vector<16x1xf32>
    %148 = vector.broadcast %147 : vector<16x1xf32> to vector<16x8xf32>
    %149 = vector.broadcast %cst_64 : f32 to vector<16x8xf32>
    %150 = arith.select %146, %148, %149 : vector<16x8xi1>, vector<16x8xf32>
    %151 = tpu.iota {dimensions = array<i32: 0>} : vector<2x16xi32>
    %152 = tpu.iota {dimensions = array<i32: 1>} : vector<2x16xi32>
    %c8_i32_65 = arith.constant 8 : i32
    %153 = vector.broadcast %c8_i32_65 : i32 to vector<2x16xi32>
    %154 = arith.muli %151, %153 : vector<2x16xi32>
    %155 = arith.subi %152, %154 : vector<2x16xi32>
    %c8_i32_66 = arith.constant 8 : i32
    %156 = vector.broadcast %c8_i32_66 : i32 to vector<2x16xi32>
    %157 = arith.cmpi ult, %155, %156 : vector<2x16xi32>
    %158 = arith.extui %157 : vector<2x16xi1> to vector<2x16xi32>
    %159 = arith.sitofp %158 : vector<2x16xi32> to vector<2x16xf32>
    %cst_67 = arith.constant dense<0.000000e+00> : vector<2x8xf32>
    %160 = tpu.matmul %159, %150, %cst_67 {dimension_numbers = #tpu.dot_dimension_numbers<[1], [0], [0], [1], [0, 0, 1, 1], [], []>} : vector<2x16xf32>, vector<16x8xf32>, vector<2x8xf32> -> vector<2x8xf32>
    %c0_68 = arith.constant 0 : index
    %c0_69 = arith.constant 0 : index
    %161 = vector.load %arg5[%c0_68, %c0_69] : memref<2x8xf32, #tpu.memory_space<vmem>>, vector<2x8xf32>
    tpu.vector_store %arg5[%c0_68, %c0_69], %160 {strides = array<i32>} : memref<2x8xf32, #tpu.memory_space<vmem>>, vector<2x8xf32>,
    return
  }
  func.func @transform_0(%arg0: i32) -> (i32, i32) {
    %c0_i32 = arith.constant 0 : i32
    %c0_i32_0 = arith.constant 0 : i32
    return %arg0, %c0_i32 : i32, i32
  }
  func.func @transform_1(%arg0: i32) -> (i32, i32, i32) {
    %c0_i32 = arith.constant 0 : i32
    %c0_i32_0 = arith.constant 0 : i32
    %c0_i32_1 = arith.constant 0 : i32
    %c0_i32_2 = arith.constant 0 : i32
    return %c0_i32, %c0_i32_0, %c0_i32_1 : i32, i32, i32
  }
  func.func @transform_2(%arg0: i32) -> (i32, i32, i32) {
    %c0_i32 = arith.constant 0 : i32
    %c0_i32_0 = arith.constant 0 : i32
    %c0_i32_1 = arith.constant 0 : i32
    %c0_i32_2 = arith.constant 0 : i32
    return %c0_i32, %c0_i32_0, %c0_i32_1 : i32, i32, i32
  }
  func.func @transform_3(%arg0: i32) -> (i32, i32) {
    %c0_i32 = arith.constant 0 : i32
    %c0_i32_0 = arith.constant 0 : i32
    %c0_i32_1 = arith.constant 0 : i32
    return %c0_i32, %c0_i32_0 : i32, i32
  }
  func.func @transform_4(%arg0: i32) -> (i32, i32) {
    %c0_i32 = arith.constant 0 : i32
    %c0_i32_0 = arith.constant 0 : i32
    return %arg0, %c0_i32 : i32, i32
  }
}

</mosaic_0001>

<bundles_post_ra>
// kernel: tpu_custom_call.1
= control target key start
LH: loop header
LB: loop body
LE: loop exit
PB: predicated region body
PF: predicated region fallthrough
CT: control target
= control target key end

     0   :  { %9 = vsyncpa [#allocation3], 0  ;;  %s1354_s0 = inlined_call_operand.hbm [shape: f32[16,32], index: 0, kind: input, shape index: {}]   ;;  %s1355_s1 = inlined_call_operand.hbm [shape: f32[3,32,64], index: 1, kind: input, shape index: {}]   ;;  %s1356_s2 = inlined_call_operand.hbm [shape: f32[3,64,64], index: 2, kind: input, shape index: {}]   ;;  %s1357_s3 = inlined_call_operand.hbm [shape: f32[8,64], index: 3, kind: input, shape index: {}]   ;;  %s1358_s4 = inlined_call_operand.hbm [shape: f32[2,8], index: 4, kind: output, shape index: {}]  }
   0x1   :  { %10 = vsyncpa [#allocation6], 0 }
   0x2   :  { %11 = vsyncpa [#allocation9], 0 }
   0x3   :  { %12 = vsyncpa [#allocation4], 0  ;;  %s1209_s15 = smov [#allocation5]   ;;  %s1210_s17 = smov [#allocation2]  }
   0x4   :  { %s30_s16 = sshll.u32 %s1209_s15, 4  ;;  %s18_s18 = sshll.u32 %s1210_s17, 4  ;;  %s31_s16 = int_to_ptr.vmem [resolvable:$true] %s30_s16  ;;  %s19_s18 = int_to_ptr.vmem [resolvable:$true] %s18_s18 }
   0x5   :  { %s1109_s19 = scalar_lea.vmem %s31_s16, 1536  ;;  %p1114_p1 = scmp.lt.s32.totalorder %s31_s16, %s31_s16 }
   0x6   :  { %p1110_p0 = scmp.ne.s32.totalorder %s31_s16, %s1109_s19  ;;  %p1115_p2 = scmp.lt.s32.totalorder %s1109_s19, %s1109_s19 }
   0x8   :  { %p1116_p3 = por %p1115_p2, %p1114_p1 }
   0xa   :  { %p1117_p4 = pnand %p1116_p3, %p1110_p0 }
   0xc   :  { %1120 = shalt.err (!%p1117_p4)
}
   0xd   :  { %s1211_s20 = smov 128   ;;  %s1212_s21 = smov 8  }
   0xe   :  { %36 = dma.hbm_to_vmem [thread:$0]  %s1355_s1, 1536, %s31_s16, [#allocation6], %s1211_s20, %s1211_s20, %s1212_s21  }
   0xf   :  { %s1129_s24 = scalar_lea.vmem %s19_s18, 256  ;;  %p1134_p6 = scmp.lt.s32.totalorder %s19_s18, %s19_s18 }
  0x10   :  { %p1130_p5 = scmp.ne.s32.totalorder %s19_s18, %s1129_s24  ;;  %p1135_p7 = scmp.lt.s32.totalorder %s1129_s24, %s1129_s24 }
  0x12   :  { %p1136_p8 = por %p1135_p7, %p1134_p6 }
  0x14   :  { %p1137_p9 = pnand %p1136_p8, %p1130_p5 }
  0x16   :  { %1140 = shalt.err (!%p1137_p9)
}
  0x17   :  { %24 = dma.hbm_to_vmem [thread:$0]  %s1354_s0, 256, %s19_s18, [#allocation3], %s1211_s20, %s1211_s20, %s1212_s21  }
  0x18   :  { %s1213_s27 = smov [#allocation7]   ;;  %s1214_s29 = smov [#allocation8]  }
  0x19   :  { %s42_s28 = sshll.u32 %s1213_s27, 4  ;;  %s55_s30 = sshll.u32 %s1214_s29, 4  ;;  %s43_s28 = int_to_ptr.vmem [resolvable:$true] %s42_s28  ;;  %s56_s30 = int_to_ptr.vmem [resolvable:$true] %s55_s30 }
  0x1a   :  { %s1149_s5 = scalar_lea.vmem %s43_s28, 3072  ;;  %p1154_p11 = scmp.lt.s32.totalorder %s43_s28, %s43_s28 }
  0x1b   :  { %p1150_p10 = scmp.ne.s32.totalorder %s43_s28, %s1149_s5  ;;  %p1155_p12 = scmp.lt.s32.totalorder %s1149_s5, %s1149_s5 }
  0x1d   :  { %p1156_p13 = por %p1155_p12, %p1154_p11 }
  0x1f   :  { %p1157_p0 = pnand %p1156_p13, %p1150_p10 }
  0x21   :  { %1160 = shalt.err (!%p1157_p0)
}
  0x22   :  { %48 = dma.hbm_to_vmem [thread:$0]  %s1356_s2, 3072, %s43_s28, [#allocation6], %s1211_s20, %s1211_s20, %s1212_s21  }
  0x23   :  { %s1169_s7 = scalar_lea.vmem %s56_s30, 128  ;;  %p1174_p2 = scmp.lt.s32.totalorder %s56_s30, %s56_s30 }
  0x24   :  { %p1170_p1 = scmp.ne.s32.totalorder %s56_s30, %s1169_s7  ;;  %p1175_p3 = scmp.lt.s32.totalorder %s1169_s7, %s1169_s7 }
  0x26   :  { %p1176_p4 = por %p1175_p3, %p1174_p2 }
  0x28   :  { %p1177_p5 = pnand %p1176_p4, %p1170_p1 }
  0x2a   :  { %1180 = shalt.err (!%p1177_p5)
}
  0x2b   :  { %58 = dma.hbm_to_vmem [thread:$0]  %s1357_s3, 128, %s56_s30, [#allocation9]  }
  0x2c   :  { %1201 = dma.done.wait [#allocation3], 256  }
  0x2d   :  { %1202 = vsyncadd [#allocation3], 4294967040 }
  0x2e   :  { %1203 = dma.done.wait [#allocation6], 4608  }
  0x2f   :  { %1204 = vsyncadd [#allocation6], 4294962688 }
  0x30   :  { %1205 = dma.done.wait [#allocation9], 128  }
  0x31   :  { %1206 = vsyncadd [#allocation9], 4294967168  ;;  %v73_v0 = vlaneseq  ;;  %v124_v5 = vld [vmem:[#allocation5 + $0x18] sm:$0xff]  ;;  %v123_v7 = vld [vmem:[#allocation5 + $0x10] sm:$0xff]  ;;  %vm125_vm4 = vcmask 261120   ;;  %vm399_vm7 = vcmask 523264  }
  0x32   :  { %v105_v6 = vld [vmem:[#allocation5 + $0x38] sm:$0xff]  ;;  %984 = vmatprep.subr.mxu0 %v124_v5  ;;  %v104_v9 = vld [vmem:[#allocation5 + $0x30] sm:$0xff]  ;;  %v122_v12 = vld [vmem:[#allocation5 + $0x8] sm:$0xff]  ;;  %vm1217_vm8 = vmmov 0   ;;  %vm816_vm12 = vcmask 130048   ;;  %s1218_s2 = smov [#allocation10]  }
  0x33   :  { %v1257_v1 = vshrl.u32 %v73_v0, 7  ;;  %995 = vmatprep.subr.mxu1 %v105_v6  ;;  %985 = vmatpush3.msra.mxu0 %v124_v5  ;;  %v103_v13 = vld [vmem:[#allocation5 + $0x28] sm:$0xff]  ;;  %v71_v14 = vld [vmem:[#allocation2] sm:$0xff]  ;;  %v72_v15 = vld [vmem:[#allocation2 + $0x8] sm:$0xff]  ;;  %s898_s3 = sshll.u32 %s1218_s2, 4  ;;  %vm890_vm13 = vcmask 58368   ;;  %s899_s3 = int_to_ptr.vmem [resolvable:$true] %s898_s3 }
  0x34   :  { %996 = vmatpush3.msra.mxu1 %v105_v6  ;;  %986 = vmatprep.subr.mxu0 %v123_v7  ;;  %v106_v16 = vrot.slane %v71_v14, 7  ;;  %v288_v17 = vrot.slane %v71_v14, 1  ;;  %v121_v18 = vld [vmem:[#allocation5] sm:$0xff]  ;;  %v107_v20 = vrot.slane %v72_v15, 7  ;;  %v289_v21 = vrot.slane %v72_v15, 1  ;;  %v307_v27 = vld [vmem:[#allocation5 + $0x58] sm:$0xff]  ;;  %p1186_p7 = scmp.lt.s32.totalorder %s899_s3, %s899_s3 }
  0x35   :  { %v1260_v2 = vand.u32 7, %v1257_v1  ;;  %v75_v3 = vadd.s32 8, %v1257_v1  ;;  %997 = vmatprep.subr.mxu1 %v104_v9  ;;  %vm108_vm0 = vcmp.lt.s32.totalorder %v1257_v1, 1  ;;  %vm290_vm1 = vcmp.lt.s32.totalorder %v1257_v1, 7  ;;  %987 = vmatpush3.msra.mxu0 %v123_v7  ;;  %v102_v19 = vld [vmem:[#allocation5 + $0x20] sm:$0xff]  ;;  %v306_v30 = vld [vmem:[#allocation5 + $0x50] sm:$0xff] }
  0x36   :  { %998 = vmatpush3.msra.mxu1 %v104_v9  ;;  %988 = vmatprep.subr.mxu0 %v122_v12  ;;  %v110_v22 = vsel %vm108_vm0, %v107_v20, %v106_v16  ;;  %v109_v23 = vsel %vm108_vm0, %v106_v16, %v107_v20  ;;  %v291_v24 = vsel %vm290_vm1, %v288_v17, %v289_v21  ;;  %v305_v31 = vld [vmem:[#allocation5 + $0x48] sm:$0xff]  ;;  %v304_v33 = vld [vmem:[#allocation5 + $0x40] sm:$0xff]  ;;  %v450_v60 = vld [vmem:[#allocation7 + $0x78] sm:$0xff]  ;;  %s1181_s9 = scalar_lea.vmem %s899_s3, 32 }
  0x37   :  { %v1263_v4 = vand.u32 7, %v75_v3  ;;  %v1266_v8 = vadd.s32 4294967295, %v1260_v2  ;;  %v1272_v11 = vadd.s32 1, %v1260_v2  ;;  %999 = vmatprep.subr.mxu1 %v103_v13  ;;  %989 = vmatpush3.msra.mxu0 %v122_v12  ;;  %v292_v32 = vsel %vm290_vm1, %v289_v21, %v288_v17  ;;  %v915_v45 = vld [vmem:[#allocation8] ss:$0 sm:$0xff]  ;;  %v449_v61 = vld [vmem:[#allocation7 + $0x70] sm:$0xff]  ;;  %p1182_p6 = scmp.ne.s32.totalorder %s899_s3, %s1181_s9  ;;  %p1187_p8 = scmp.lt.s32.totalorder %s1181_s9, %s1181_s9 }
  0x38   :  { %1000 = vmatpush3.msra.mxu1 %v103_v13  ;;  %990 = vmatprep.subr.mxu0 %v121_v18  ;;  %v464_v62 = vld [vmem:[#allocation7 + $0x38] sm:$0xff]  ;;  %v463_v63 = vld [vmem:[#allocation7 + $0x30] sm:$0xff]  ;;  %v448_v3 = vld [vmem:[#allocation7 + $0x68] sm:$0xff] }
  0x39   :  { %v1269_v10 = vadd.s32 4294967295, %v1263_v4  ;;  %vm113_vm2 = vcmp.lt.u32.totalorder %v1266_v8, 8  ;;  %vm295_vm5 = vcmp.lt.u32.totalorder %v1272_v11, 8  ;;  %1001 = vmatprep.subr.mxu1 %v102_v19  ;;  %991 = vmatpush3.msra.mxu0 %v121_v18  ;;  %v1294_v29 = vadd.s32 1, %v1263_v4  ;;  %v462_v5 = vld [vmem:[#allocation7 + $0x28] sm:$0xff]  ;;  %v447_v6 = vld [vmem:[#allocation7 + $0x60] sm:$0xff]  ;;  %p1188_p9 = por %p1187_p8, %p1186_p7 }
  0x3a   :  { %v119_v25 = vsel %vm113_vm2, %v110_v22, 0.0  ;;  %v301_v28 = vsel %vm295_vm5, %v291_v24, 0.0  ;;  %1002 = vmatpush3.msra.mxu1 %v102_v19  ;;  %1003 = vmatprep.mubr.msk.f32.mxu1 %vm125_vm4, %v71_v14  ;;  %v461_v7 = vld [vmem:[#allocation7 + $0x20] sm:$0xff]  ;;  %v446_v9 = vld [vmem:[#allocation7 + $0x58] sm:$0xff]  ;;  %v445_v13 = vld [vmem:[#allocation7 + $0x50] sm:$0xff] }
  0x3b   :  { %vm114_vm3 = vcmp.lt.u32.totalorder %v1269_v10, 8  ;;  %992 = vmatprep.mubr.msk.f32.mxu0 %vm125_vm4, %v119_v25  ;;  %1004 = vmatmul.mubr.msk.f32.vlgmr.msra.gmra.mxu1 %vm125_vm4, %v72_v15  ;;  %vm296_vm6 = vcmp.lt.u32.totalorder %v1294_v29, 8  ;;  %v460_v12 = vld [vmem:[#allocation7 + $0x18] sm:$0xff]  ;;  %v444_v14 = vld [vmem:[#allocation7 + $0x48] sm:$0xff]  ;;  %v459_v15 = vld [vmem:[#allocation7 + $0x10] sm:$0xff]  ;;  %p1189_p10 = pnand %p1188_p9, %p1182_p6 }
  0x3c   :  { %v120_v26 = vsel %vm114_vm3, %v109_v23, 0.0  ;;  %1006 = vmatprep.subr.mxu0 %v307_v27  ;;  %v302_v34 = vsel %vm296_vm6, %v292_v32, 0.0  ;;  %1017 = vmatprep.subr.mxu1 %v464_v62  ;;  %v443_v16 = vld [vmem:[#allocation7 + $0x40] sm:$0xff]  ;;  %v458_v17 = vld [vmem:[#allocation7 + $0x8] sm:$0xff]  ;;  %v641_v19 = vld [vmem:[#allocation7 + $0xb8] sm:$0xff] }
  0x3d   :  { %993 = vmatmul.mubr.msk.f32.vlgmr.msra.gmra.mxu0 %vm125_vm4, %v120_v26  ;;  %1018 = vmatpush3.msra.mxu1 %v464_v62  ;;  %v457_v18 = vld [vmem:[#allocation7] sm:$0xff]  ;;  %v637_v8 = vld [vmem:[#allocation7 + $0x98] sm:$0xff]  ;;  %v636_v10 = vld [vmem:[#allocation7 + $0x90] sm:$0xff] }
  0x3e   :  { %1014 = vmatprep.mubr.msk.f32.mxu0 %vm125_vm4, %v301_v28  ;;  %1007 = vmatpush3.msra.mxu0 %v307_v27  ;;  %v916_v27 = vld [vmem:[#allocation8 + $0x1] ss:$0 sm:$0xff] }
  0x3f   :  { %1008 = vmatprep.subr.mxu0 %v306_v30  ;;  %1019 = vmatprep.subr.mxu1 %v463_v63  ;;  %v634_v11 = vld [vmem:[#allocation7 + $0x80] sm:$0xff] }
  0x40   :  { %1009 = vmatpush3.msra.mxu0 %v306_v30  ;;  %1020 = vmatpush3.msra.mxu1 %v463_v63  ;;  %v917_v30 = vld [vmem:[#allocation8 + $0x2] ss:$0 sm:$0xff] }
  0x41   :  { %1010 = vmatprep.subr.mxu0 %v305_v31  ;;  %1021 = vmatprep.subr.mxu1 %v462_v5 }
  0x42   :  { %1011 = vmatpush3.msra.mxu0 %v305_v31  ;;  %1022 = vmatpush3.msra.mxu1 %v462_v5 }
  0x43   :  { %1012 = vmatprep.subr.mxu0 %v304_v33  ;;  %1023 = vmatprep.subr.mxu1 %v461_v7 }
  0x44   :  { %1013 = vmatpush3.msra.mxu0 %v304_v33  ;;  %1024 = vmatpush3.msra.mxu1 %v461_v7 }
  0x45   :  { %1015 = vmatmul.mubr.msk.f32.vlgmr.msra.gmra.mxu0 %vm125_vm4, %v302_v34  ;;  %1036 = vmatprep.subr.mxu0 %v450_v60 }
  0x46   :  { %1037 = vmatpush3.msra.mxu0 %v450_v60  ;;  %1025 = vmatprep.subr.mxu1 %v460_v12 }
  0x47   :  { %1038 = vmatprep.subr.mxu0 %v449_v61  ;;  %1026 = vmatpush3.msra.mxu1 %v460_v12 }
  0x48   :  { %1039 = vmatpush3.msra.mxu0 %v449_v61  ;;  %1027 = vmatprep.subr.mxu1 %v459_v15  ;;  %v924_v61 = vld [vmem:[#allocation8 + $0x3] ss:$0 sm:$0xff] }
  0x49   :  { %1040 = vmatprep.subr.mxu0 %v448_v3  ;;  %1028 = vmatpush3.msra.mxu1 %v459_v15 }
  0x4a   :  { %1041 = vmatpush3.msra.mxu0 %v448_v3  ;;  %1029 = vmatprep.subr.mxu1 %v458_v17 }
  0x4b   :  { %1042 = vmatprep.subr.mxu0 %v447_v6  ;;  %1030 = vmatpush3.msra.mxu1 %v458_v17 }
  0x4c   :  { %1043 = vmatpush3.msra.mxu0 %v447_v6  ;;  %1031 = vmatprep.subr.mxu1 %v457_v18 }
  0x4d   :  { %1044 = vmatprep.subr.mxu0 %v446_v9  ;;  %1032 = vmatpush3.msra.mxu1 %v457_v18 }
  0x4e   :  { %1045 = vmatpush3.msra.mxu0 %v446_v9  ;;  %1055 = vmatprep.subr.mxu1 %v641_v19 }
  0x4f   :  { %1046 = vmatprep.subr.mxu0 %v445_v13 }
  0x50   :  { %1047 = vmatpush3.msra.mxu0 %v445_v13 }
  0x51   :  { %1048 = vmatprep.subr.mxu0 %v444_v14 }
  0x52   :  { %1049 = vmatpush3.msra.mxu0 %v444_v14 }
  0x53   :  { %1050 = vmatprep.subr.mxu0 %v443_v16 }
  0x54   :  { %1051 = vmatpush3.msra.mxu0 %v443_v16 }
  0xfb   :  { %v1005_v36 = vpop.f32.mrf.mxu1 }
  0xfd   :  { %v994_v35 = vpop.f32.mrf.mxu0  ;;  %v279_v38 = vpop.f32.mrf.mxu1 }
  0xfe   :  { %v285_v40 = vadd.f32 %v1005_v36, %v994_v35 }
  0xff   :  { %v198_v37 = vpop.f32.mrf.mxu0 }
 0x100   :  { %v280_v41 = vadd.f32 %v279_v38, %v198_v37 }
 0x105   :  { %v1016_v39 = vpop.f32.mrf.mxu0 }
 0x106   :  { %v390_v43 = vadd.f32 %v1016_v39, %v285_v40 }
 0x107   :  { %v380_v42 = vpop.f32.mrf.mxu0 }
 0x108   :  { %v389_v44 = vadd.f32 %v380_v42, %v280_v41  ;;  %v396_v48 = vadd.f32 %v915_v45, %v390_v43 }
 0x10a   :  { %v395_v46 = vadd.f32 %v915_v45, %v389_v44  ;;  %v403_v49 = vsel %vm399_vm7, %v396_v48, 0.0 }
 0x10c   :  { %v400_v47 = vsel %vm399_vm7, %v395_v46, 0.0 }
 0x10d   :  { %401 = vadd.xlane.f32.xlu0 %v400_v47 }
 0x111   :  { %404 = vadd.xlane.f32.xlu0 %v403_v49 }
 0x196   :  { %v402_v50 = vpop.xlane.xlu0 %401 }
 0x197   :  { %v407_v51 = vmul.f32 0.015625, %v402_v50  ;;  %v639_v50 = vld [vmem:[#allocation7 + $0xa8] sm:$0xff] }
 0x199   :  { %v1307_v52 = vsub.f32 %v395_v46, %v407_v51  ;;  %v638_v51 = vld [vmem:[#allocation7 + $0xa0] sm:$0xff] }
 0x19a   :  { %v405_v53 = vpop.xlane.xlu0 %404 }
 0x19b   :  { %v408_v54 = vmul.f32 0.015625, %v405_v53  ;;  %v411_v55 = vmul.f32 %v1307_v52, %v1307_v52 }
 0x19d   :  { %v1311_v56 = vsub.f32 %v396_v48, %v408_v54  ;;  %v413_v57 = vsel %vm399_vm7, %v411_v55, 0.0  ;;  %v640_v48 = vld [vmem:[#allocation7 + $0xb0] sm:$0xff] }
 0x19e   :  { %414 = vadd.xlane.f32.xlu1 %v413_v57 }
 0x19f   :  { %v412_v58 = vmul.f32 %v1311_v56, %v1311_v56 }
 0x1a1   :  { %v416_v59 = vsel %vm399_vm7, %v412_v58, 0.0 }
 0x1a2   :  { %417 = vadd.xlane.f32.xlu1 %v416_v59 }
 0x227   :  { %v415_v20 = vpop.xlane.xlu1 %414 }
 0x228   :  { %v419_v21 = vmul.f32 0.015625, %v415_v20 }
 0x22a   :  { %v421_v22 = vadd.f32 1e-05, %v419_v21 }
 0x22b   :  { %v418_v23 = vpop.xlane.xlu1 %417 }
 0x22c   :  { %1093 = vrsqrt.f32 %v421_v22  ;;  %v420_v24 = vmul.f32 0.015625, %v418_v23 }
 0x22e   :  { %v422_v25 = vadd.f32 1e-05, %v420_v24 }
 0x230   :  { %1095 = vrsqrt.f32 %v422_v25 }
 0x239   :  { %v1094_v26 = vpop.eup %1093 }
 0x23a   :  { %v425_v28 = vmul.f32 %v1094_v26, %v1307_v52  ;;  %v635_v52 = vld [vmem:[#allocation7 + $0x88] sm:$0xff] }
 0x23c   :  { %v431_v31 = vmul.f32 %v916_v27, %v425_v28 }
 0x23d   :  { %v1096_v32 = vpop.eup %1095 }
 0x23e   :  { %v426_v33 = vmul.f32 %v1096_v32, %v1311_v56  ;;  %v437_v34 = vadd.f32 %v917_v30, %v431_v31 }
 0x240   :  { %v432_v35 = vmul.f32 %v916_v27, %v426_v33  ;;  %v439_v36 = vmax.f32 %v437_v34, 0.0  ;;  %v926_v33 = vld [vmem:[#allocation8 + $0x5] ss:$0 sm:$0xff] }
 0x242   :  { %v438_v37 = vadd.f32 %v917_v30, %v432_v35  ;;  %1052 = vmatprep.mubr.msk.f32.mxu0 %vm399_vm7, %v439_v36  ;;  %v451_v39 = vrot.slane %v439_v36, 7  ;;  %v627_v41 = vrot.slane %v439_v36, 1  ;;  %v925_v30 = vld [vmem:[#allocation8 + $0x4] ss:$0 sm:$0xff] }
 0x244   :  { %v440_v38 = vmax.f32 %v438_v37, 0.0 }
 0x246   :  { %1053 = vmatmul.mubr.msk.f32.vlgmr.msra.gmra.mxu0 %vm399_vm7, %v440_v38  ;;  %v452_v40 = vrot.slane %v440_v38, 7  ;;  %v628_v42 = vrot.slane %v440_v38, 1  ;;  %v927_v38 = vld [vmem:[#allocation8 + $0x6] ss:$0 sm:$0xff] }
 0x248   :  { %v454_v43 = vsel %vm108_vm0, %v452_v40, %v451_v39  ;;  %v453_v44 = vsel %vm108_vm0, %v451_v39, %v452_v40  ;;  %v629_v45 = vsel %vm290_vm1, %v627_v41, %v628_v42  ;;  %v630_v53 = vsel %vm290_vm1, %v628_v42, %v627_v41 }
 0x249   :  { %v455_v46 = vsel %vm113_vm2, %v454_v43, 0.0  ;;  %v456_v47 = vsel %vm114_vm3, %v453_v44, 0.0  ;;  %v631_v49 = vsel %vm295_vm5, %v629_v45, 0.0  ;;  %v632_v54 = vsel %vm296_vm6, %v630_v53, 0.0 }
 0x24a   :  { %1033 = vmatprep.mubr.msk.f32.mxu1 %vm399_vm7, %v455_v46  ;;  %v1215_v46 = vmov 0   ;;  %v811_v53 = vmul.u32 8, %v1257_v1 }
 0x24b   :  { %1034 = vmatmul.mubr.msk.f32.vlgmr.msra.gmra.mxu1 %vm399_vm7, %v456_v47  ;;  %1091 = vset.pattern.permute.xlu0 %v1215_v46  ;;  %v1216_v47 = vmov 0.0  }
 0x24c   :  { %1056 = vmatpush3.msra.mxu1 %v641_v19  ;;  %1071 = vmatprep.mubr.msk.f32.mxu1 %vm399_vm7, %v631_v49 }
 0x24d   :  { %1057 = vmatprep.subr.mxu1 %v640_v48  ;;  %1092 = vset.pattern.permute.xlu1 %v1215_v46 }
 0x24e   :  { %1058 = vmatpush3.msra.mxu1 %v640_v48  ;;  %1074 = vmatprep.subr.mxu0 %v1216_v47  ;;  %v928_v48 = vld [vmem:[#allocation8 + $0x7] ss:$0 sm:$0xff] }
 0x24f   :  { %1059 = vmatprep.subr.mxu1 %v639_v50  ;;  %1078 = vmatprep.mubr.msk.f32.mxu0 %vm1217_vm8, %v1216_v47 }
 0x250   :  { %1060 = vmatpush3.msra.mxu1 %v639_v50 }
 0x251   :  { %1061 = vmatprep.subr.mxu1 %v638_v51 }
 0x252   :  { %1062 = vmatpush3.msra.mxu1 %v638_v51 }
 0x253   :  { %1063 = vmatprep.subr.mxu1 %v637_v8 }
 0x254   :  { %1064 = vmatpush3.msra.mxu1 %v637_v8 }
 0x255   :  { %1065 = vmatprep.subr.mxu1 %v636_v10 }
 0x256   :  { %1066 = vmatpush3.msra.mxu1 %v636_v10 }
 0x257   :  { %1067 = vmatprep.subr.mxu1 %v635_v52 }
 0x258   :  { %1068 = vmatpush3.msra.mxu1 %v635_v52 }
 0x259   :  { %1069 = vmatprep.subr.mxu1 %v634_v11 }
 0x25a   :  { %1070 = vmatpush3.msra.mxu1 %v634_v11  ;;  %v796_v11 = vand.u32 127, %v73_v0 }
 0x25b   :  { %1072 = vmatmul.mubr.msk.f32.vlgmr.msra.gmra.mxu1 %vm399_vm7, %v632_v54 }
 0x25c   :  { %v812_v54 = vsub.s32 %v796_v11, %v811_v53  ;;  %vm798_vm9 = vcmp.eq.s32.totalorder %v796_v11, %v1263_v4  ;;  %vm797_vm11 = vcmp.eq.s32.totalorder %v796_v11, %v1260_v2 }
 0x25e   :  { %vm813_vm10 = vcmp.lt.u32.totalorder %v812_v54, 8 }
 0x306   :  { %v1054_v56 = vpop.f32.mrf.mxu0 }
 0x308   :  { %v618_v59 = vpop.f32.mrf.mxu0 }
 0x30b   :  { %v1035_v55 = vpop.f32.mrf.mxu1 }
 0x30c   :  { %v624_v58 = vadd.f32 %v1054_v56, %v1035_v55  ;;  %v929_v56 = vsel %vm813_vm10, 1.0, %v1216_v47 }
 0x30d   :  { %v537_v57 = vpop.f32.mrf.mxu1 }
 0x30e   :  { %v619_v62 = vadd.f32 %v618_v59, %v537_v57 }
 0x31b   :  { %v1073_v60 = vpop.f32.mrf.mxu1 }
 0x31c   :  { %v724_v63 = vadd.f32 %v1073_v60, %v624_v58 }
 0x31d   :  { %v714_v3 = vpop.f32.mrf.mxu1 }
 0x31e   :  { %v723_v5 = vadd.f32 %v714_v3, %v619_v62  ;;  %v730_v6 = vadd.f32 %v924_v61, %v724_v63 }
 0x320   :  { %v736_v7 = vsel %vm399_vm7, %v730_v6, 0.0  ;;  %v729_v9 = vadd.f32 %v924_v61, %v723_v5 }
 0x321   :  { %737 = vadd.xlane.f32.xlu0 %v736_v7 }
 0x322   :  { %v733_v29 = vsel %vm399_vm7, %v729_v9, 0.0 }
 0x323   :  { %734 = vadd.xlane.f32.xlu1 %v733_v29 }
 0x3aa   :  { %v738_v12 = vpop.xlane.xlu0 %737 }
 0x3ab   :  { %v740_v13 = vmul.f32 0.015625, %v738_v12 }
 0x3ac   :  { %v735_v14 = vpop.xlane.xlu1 %734 }
 0x3ad   :  { %v742_v15 = vsub.f32 %v730_v6, %v740_v13  ;;  %v739_v16 = vmul.f32 0.015625, %v735_v14 }
 0x3af   :  { %v741_v17 = vsub.f32 %v729_v9, %v739_v16  ;;  %v744_v18 = vmul.f32 %v742_v15, %v742_v15 }
 0x3b1   :  { %v748_v19 = vsel %vm399_vm7, %v744_v18, 0.0  ;;  %v743_v20 = vmul.f32 %v741_v17, %v741_v17 }
 0x3b2   :  { %749 = vadd.xlane.f32.xlu0 %v748_v19 }
 0x3b3   :  { %v745_v21 = vsel %vm399_vm7, %v743_v20, 0.0 }
 0x3b4   :  { %746 = vadd.xlane.f32.xlu1 %v745_v21 }
 0x43b   :  { %v750_v22 = vpop.xlane.xlu0 %749 }
 0x43c   :  { %v752_v23 = vmul.f32 0.015625, %v750_v22 }
 0x43d   :  { %v747_v24 = vpop.xlane.xlu1 %746 }
 0x43e   :  { %v754_v25 = vadd.f32 1e-05, %v752_v23  ;;  %v751_v26 = vmul.f32 0.015625, %v747_v24 }
 0x440   :  { %1097 = vrsqrt.f32 %v754_v25  ;;  %v753_v27 = vadd.f32 1e-05, %v751_v26 }
 0x442   :  { %1099 = vrsqrt.f32 %v753_v27 }
 0x44d   :  { %v1098_v28 = vpop.eup %1097 }
 0x44e   :  { %v758_v31 = vmul.f32 %v1098_v28, %v742_v15 }
 0x44f   :  { %v1100_v32 = vpop.eup %1099 }
 0x450   :  { %v764_v34 = vmul.f32 %v925_v30, %v758_v31  ;;  %v757_v35 = vmul.f32 %v1100_v32, %v741_v17 }
 0x452   :  { %v770_v36 = vadd.f32 %v926_v33, %v764_v34  ;;  %v763_v37 = vmul.f32 %v925_v30, %v757_v35 }
 0x454   :  { %v772_v39 = vmax.f32 %v770_v36, 0.0  ;;  %v769_v40 = vadd.f32 %v926_v33, %v763_v37 }
 0x456   :  { %v779_v41 = vmul.f32 %v927_v38, %v772_v39  ;;  %v771_v42 = vmax.f32 %v769_v40, 0.0 }
 0x458   :  { %v783_v43 = vsel %vm399_vm7, %v779_v41, 0.0  ;;  %v778_v44 = vmul.f32 %v927_v38, %v771_v42 }
 0x459   :  { %784 = vadd.xlane.f32.xlu0 %v783_v43 }
 0x45a   :  { %v780_v45 = vsel %vm399_vm7, %v778_v44, 0.0 }
 0x45b   :  { %781 = vadd.xlane.f32.xlu1 %v780_v45 }
 0x4e2   :  { %v785_v49 = vpop.xlane.xlu0 %784 }
 0x4e3   :  { %v792_v50 = vadd.f32 %v928_v48, %v785_v49 }
 0x4e4   :  { %v782_v51 = vpop.xlane.xlu1 %781 }
 0x4e5   :  { %v794_v8 = vmax.f32 %v792_v50, 0.0  ;;  %v791_v10 = vadd.f32 %v928_v48, %v782_v51 }
 0x4e7   :  { %v793_v52 = vmax.f32 %v791_v10, 0.0  ;;  %806 = vperm.xlu0 %1091, %v794_v8  }
 0x4e9   :  { %801 = vperm.xlu1 %1092, %v793_v52  }
 0x562   :  { %v807_v55 = vpop.permute.xlu0 %806 }
 0x563   :  { %1075 = vmatpush3.msk.msra.mxu0 %vm798_vm9, %v807_v55 }
 0x564   :  { %1076 = vmatprep.subr.mxu0 %v1216_v47  ;;  %v802_v57 = vpop.permute.xlu1 %801 }
 0x565   :  { %1077 = vmatpush3.msk.msra.mxu0 %vm797_vm11, %v802_v57 }
 0x566   :  { %1079 = vmatmul.mubr.msk.f32.vlgmr.msra.gmra.mxu0 %vm816_vm12, %v929_v56 }
 0x626   :  { %v886_v0 = vpop.f32.mrf.mxu0 }
 0x627   :  { %891 = vst.msk [vmem:[#allocation10] sm:$0x3] %vm890_vm13, %v886_v0 }
 0x628   :  { %v1080_v1 = vpop.f32.mrf.mxu0 }
 0x629   :  { %1192 = shalt.err (!%p1189_p10)
}
 0x62a   :  { %901 = dma.vmem_to_hbm [thread:$0]  %s899_s3, 32, %s1358_s4, [#allocation4]  }
 0x62b   :  { %1207 = dma.done.wait [#allocation4], 32  }
 0x62c   :  { %1208 = vsyncadd [#allocation4], 4294967264 }
 0x62d   :  { %905 = vsyncpa [#allocation3], 1 }
 0x62e   :  { %906 = vsyncpa [#allocation6], 1 }
 0x62f   :  { %907 = vsyncpa [#allocation9], 1 }
 0x630   :  { %908 = vsyncpa [#allocation4], 1 }

</bundles_post_ra>
